<compile_context>
chip_gen: v6e
topology: v6e:2x2x1
jax: 0.10.0
libtpu: 0.0.40
codegen_flags: <defaults>
</compile_context>

<pallas_src>
import functools
import math

import jax
import jax.numpy as jnp
from jax.experimental import pallas as pl
from jax.experimental.pallas import tpu as pltpu


def _head_attention_kernel(seed_ref, x_ref, wq_ref, wk_ref, wv_ref, o_ref,
                           k_scr, v_scr, *, scale, tq, p_dropout, training):
    # x_ref:   (1, T, C)   resident token block for this batch
    # w*_ref:  (C, hs)     resident projection weights
    # o_ref:   (1, tq, hs) output tile for this (batch, q-tile)
    # k_scr/v_scr: (T, hs) per-batch K/V scratch (computed once per batch)
    b = pl.program_id(0)
    qi = pl.program_id(1)
    T = x_ref.shape[1]
    dt = x_ref.dtype

    # K / V are shared by every query tile of this batch -> compute once.
    @pl.when(qi == 0)
    def _():
        x_full = x_ref[0]                                            # (T, C)
        k_scr[...] = jnp.dot(x_full, wk_ref[...],
                             preferred_element_type=jnp.float32).astype(k_scr.dtype)
        v_scr[...] = jnp.dot(x_full, wv_ref[...],
                             preferred_element_type=jnp.float32).astype(v_scr.dtype)

    q_start = pl.multiple_of(qi * tq, tq)
    x_q = x_ref[0, pl.ds(q_start, tq), :]                            # (tq, C)
    q = jnp.dot(x_q, wq_ref[...],
                preferred_element_type=jnp.float32).astype(dt)       # (tq, hs)

    k = k_scr[...]
    v = v_scr[...]

    # Scaled scores q @ k^T (contract the head dim; no materialized transpose).
    s = jax.lax.dot_general(q, k, (((1,), (1,)), ((), ())),
                            preferred_element_type=jnp.float32) * scale  # (tq, T)

    # Causal (tril) mask: key index must be <= global query index.
    q_idx = q_start + jax.lax.broadcasted_iota(jnp.int32, (tq, T), 0)
    k_idx = jax.lax.broadcasted_iota(jnp.int32, (tq, T), 1)
    s = jnp.where(k_idx <= q_idx, s, -jnp.inf)

    # Softmax over keys in f32.  The diagonal entry is always unmasked, so the
    # reference's NaN -> 0 fixup can never trigger on this path.
    m = jnp.max(s, axis=-1, keepdims=True)
    e = jnp.exp(s - m)
    denom = jnp.sum(e, axis=-1, keepdims=True)
    p = e * pl.reciprocal(denom, approx=True)

    if training and p_dropout > 0.0:
        # Inverted dropout on the attention probabilities (uint32 threshold
        # compare on raw PRNG bits).
        # TODO(synk): the TPU hardware PRNG cannot reproduce torch's RNG stream.
        pltpu.prng_seed(seed_ref[0] + b * pl.num_programs(1) + qi)
        bits = pltpu.bitcast(pltpu.prng_random_bits(p.shape), jnp.uint32)
        threshold = jnp.uint32(min(int(p_dropout * 4294967296.0), 4294967295))
        p = jnp.where(bits >= threshold, p * (1.0 / (1.0 - p_dropout)), 0.0)

    # Weighted sum of values.
    out = jnp.dot(p.astype(dt), v, preferred_element_type=jnp.float32)  # (tq, hs)
    o_ref[0] = out.astype(o_ref.dtype)


def _pick_q_tile(T):
    for t in (512, 256, 128):
        if T % t == 0:
            return t
    return T  # short sequences: single full-extent tile (always layout-legal)


def head_attention(x, wq, wk, wv, *, p_dropout=0.0, training=False, seed=0):
    """x: (B, T, C); wq/wk/wv: (C, head_size) (torch Linear weight, transposed)."""
    B, T, C = x.shape
    hs = wq.shape[1]
    assert wq.shape == (C, hs) and wk.shape == (C, hs) and wv.shape == (C, hs)

    tq = _pick_q_tile(T)
    assert T % tq == 0
    nq = T // tq

    scale = 1.0 / math.sqrt(hs)
    kernel = functools.partial(_head_attention_kernel, scale=scale, tq=tq,
                               p_dropout=float(p_dropout),
                               training=bool(training))
    seed_arr = jnp.array([seed], dtype=jnp.int32)

    # Scoped-VMEM budget with headroom (clamped well under v7x's 64 MiB).
    itemsize = jnp.dtype(x.dtype).itemsize
    est = (2 * T * C * itemsize            # resident token block (double-buffered)
           + 2 * 3 * C * hs * itemsize     # projection weights
           + 2 * tq * hs * itemsize        # output tile
           + 2 * T * hs * itemsize         # K/V scratch
           + 4 * tq * T * 4                # f32 scores / probs intermediates
           + 2 * tq * hs * 4)              # f32 q / out intermediates
    vmem_limit = int(min(max(2 * est, 16 * 1024 * 1024), 48 * 1024 * 1024))

    out = pl.pallas_call(
        kernel,
        out_shape=jax.ShapeDtypeStruct((B, T, hs), x.dtype),
        grid_spec=pltpu.PrefetchScalarGridSpec(
            num_scalar_prefetch=1,                   # dropout seed lands in SMEM
            grid=(B, nq),
            in_specs=[
                # Full (T, C) token block; constant block index along qi ->
                # DMA'd once per batch, resident across query tiles.
                pl.BlockSpec((1, T, C), lambda b, qi, s: (b, 0, 0)),
                pl.BlockSpec((C, hs), lambda b, qi, s: (0, 0)),   # Wq
                pl.BlockSpec((C, hs), lambda b, qi, s: (0, 0)),   # Wk
                pl.BlockSpec((C, hs), lambda b, qi, s: (0, 0)),   # Wv
            ],
            out_specs=pl.BlockSpec((1, tq, hs), lambda b, qi, s: (b, qi, 0)),
            scratch_shapes=[pltpu.VMEM((T, hs), x.dtype),         # K scratch
                            pltpu.VMEM((T, hs), x.dtype)],        # V scratch
        ),
        compiler_params=pltpu.CompilerParams(
            # qi must be sequential so the qi==0 K/V computation precedes reuse.
            dimension_semantics=("parallel", "arbitrary"),
            vmem_limit_bytes=vmem_limit),
    )(seed_arr, x, wq, wk, wv)
    return out


# TODO(synk): the optional `attention_mask` branch of the PyTorch forward (and
# its NaN->0 fixup for fully-masked rows) is not implemented; only the default
# attention_mask=None causal path is translated.


def _reference(x, wq, wk, wv, head_size):
    """Pure-JAX eval-mode reference matching the PyTorch forward."""
    B, T, C = x.shape
    q = x @ wq
    k = x @ wk
    v = x @ wv
    s = jnp.einsum('btd,bsd->bts', q, k) * (1.0 / math.sqrt(head_size))
    tril = jnp.tril(jnp.ones((T, T), dtype=bool))
    s = jnp.where(tril[None, :, :], s, -jnp.inf)
    p = jax.nn.softmax(s, axis=-1)
    return jnp.einsum('bts,bsd->btd', p, v)


def _run_case(key, B, T, C, head_size):
    kx, kq, kk, kv = jax.random.split(key, 4)
    x = jax.random.normal(kx, (B, T, C), dtype=jnp.float32)
    # nn.Linear(C, head_size, bias=False) default init: U(-1/sqrt(C), 1/sqrt(C)),
    # stored here pre-transposed as (C, head_size).
    bound = 1.0 / math.sqrt(C)
    wq = jax.random.uniform(kq, (C, head_size), jnp.float32, -bound, bound)
    wk = jax.random.uniform(kk, (C, head_size), jnp.float32, -bound, bound)
    wv = jax.random.uniform(kv, (C, head_size), jnp.float32, -bound, bound)

    # Eval-mode forward (dropout identity, matching module.eval()).
    y = head_attention(x, wq, wk, wv, p_dropout=0.2, training=False)
    y = jax.block_until_ready(y)

    ref = _reference(x, wq, wk, wv, head_size)
    assert y.shape == (B, T, head_size) and y.dtype == x.dtype
    err = float(jnp.max(jnp.abs(y - ref)))
    assert jnp.allclose(y, ref, atol=2e-2, rtol=2e-2), err


if __name__ == "__main__":
    key = jax.random.PRNGKey(0)
    k1, k2 = jax.random.split(key)

    # Small demo shape (single q-tile path).
    _run_case(k1, B=2, T=8, C=32, head_size=16)
    # Multi-tile path (tq=128, two query tiles) to exercise the K/V scratch reuse.
    _run_case(k2, B=2, T=256, C=64, head_size=32)

    print("KERNEL_OK")
</pallas_src>

<mosaic_0001>
module attributes {stable_mosaic.version = 11 : i64} {
  func.func @_head_attention_kernel(%arg0: i32, %arg1: i32, %arg2: memref<1xi32, #tpu.memory_space<smem>>, %arg3: memref<1x8x32xf32, #tpu.memory_space<vmem>>, %arg4: memref<32x16xf32, #tpu.memory_space<vmem>>, %arg5: memref<32x16xf32, #tpu.memory_space<vmem>>, %arg6: memref<32x16xf32, #tpu.memory_space<vmem>>, %arg7: memref<1x8x16xf32, #tpu.memory_space<vmem>>, %arg8: memref<8x16xf32, #tpu.memory_space<vmem>>, %arg9: memref<8x16xf32, #tpu.memory_space<vmem>>) attributes {dimension_semantics = [#tpu.dimension_semantics<parallel>, #tpu.dimension_semantics<arbitrary>], iteration_bounds = array<i64: 2, 1>, scalar_prefetch = 1 : i64, scratch_operands = 2 : i64, tpu.core_type = #tpu.core_type<tc>, window_params = [{transform_indices = @transform_0, window_bounds = array<i64: 1, 8, 32>}, {pipeline_mode = #tpu.pipeline_mode<synchronous>, transform_indices = @transform_1, window_bounds = array<i64: 32, 16>}, {pipeline_mode = #tpu.pipeline_mode<synchronous>, transform_indices = @transform_2, window_bounds = array<i64: 32, 16>}, {pipeline_mode = #tpu.pipeline_mode<synchronous>, transform_indices = @transform_3, window_bounds = array<i64: 32, 16>}, {transform_indices = @transform_4, window_bounds = array<i64: 1, 8, 16>}]} {
    %c0_i32 = arith.constant 0 : i32
    %0 = arith.cmpi eq, %arg1, %c0_i32 : i32
    %1 = arith.extui %0 : i1 to i32
    %c0_i32_0 = arith.constant 0 : i32
    %2 = arith.cmpi ne, %1, %c0_i32_0 : i32
    scf.if %2 {
      %c0_17 = arith.constant 0 : index
      %c0_18 = arith.constant 0 : index
      %c0_19 = arith.constant 0 : index
      %36 = vector.load %arg3[%c0_17, %c0_18, %c0_19] : memref<1x8x32xf32, #tpu.memory_space<vmem>>, vector<1x8x32xf32>
      %37 = vector.shape_cast %36 : vector<1x8x32xf32> to vector<8x32xf32>
      %c0_20 = arith.constant 0 : index
      %c0_21 = arith.constant 0 : index
      %38 = vector.load %arg5[%c0_20, %c0_21] : memref<32x16xf32, #tpu.memory_space<vmem>>, vector<32x16xf32>
      %cst_22 = arith.constant dense<0.000000e+00> : vector<8x16xf32>
      %39 = tpu.matmul %37, %38, %cst_22 {dimension_numbers = #tpu.dot_dimension_numbers<[1], [0], [0], [1], [0, 0, 1, 1], [], []>} : vector<8x32xf32>, vector<32x16xf32>, vector<8x16xf32> -> vector<8x16xf32>
      %c0_23 = arith.constant 0 : index
      %c0_24 = arith.constant 0 : index
      %40 = vector.load %arg8[%c0_23, %c0_24] : memref<8x16xf32, #tpu.memory_space<vmem>>, vector<8x16xf32>
      tpu.vector_store %arg8[%c0_23, %c0_24], %39 {strides = array<i32>} : memref<8x16xf32, #tpu.memory_space<vmem>>, vector<8x16xf32>,
      %c0_25 = arith.constant 0 : index
      %c0_26 = arith.constant 0 : index
      %41 = vector.load %arg6[%c0_25, %c0_26] : memref<32x16xf32, #tpu.memory_space<vmem>>, vector<32x16xf32>
      %cst_27 = arith.constant dense<0.000000e+00> : vector<8x16xf32>
      %42 = tpu.matmul %37, %41, %cst_27 {dimension_numbers = #tpu.dot_dimension_numbers<[1], [0], [0], [1], [0, 0, 1, 1], [], []>} : vector<8x32xf32>, vector<32x16xf32>, vector<8x16xf32> -> vector<8x16xf32>
      %c0_28 = arith.constant 0 : index
      %c0_29 = arith.constant 0 : index
      %43 = vector.load %arg9[%c0_28, %c0_29] : memref<8x16xf32, #tpu.memory_space<vmem>>, vector<8x16xf32>
      tpu.vector_store %arg9[%c0_28, %c0_29], %42 {strides = array<i32>} : memref<8x16xf32, #tpu.memory_space<vmem>>, vector<8x16xf32>,
    } else {
    }
    %c8_i32 = arith.constant 8 : i32
    %3 = arith.muli %arg1, %c8_i32 : i32
    %4 = tpu.assume_multiple %3, 8 : i32
    %c0 = arith.constant 0 : index
    %5 = arith.index_cast %4 : i32 to index
    %c0_1 = arith.constant 0 : index
    %6 = vector.load %arg3[%c0, %5, %c0_1] : memref<1x8x32xf32, #tpu.memory_space<vmem>>, vector<1x8x32xf32>
    %7 = vector.shape_cast %6 : vector<1x8x32xf32> to vector<8x32xf32>
    %c0_2 = arith.constant 0 : index
    %c0_3 = arith.constant 0 : index
    %8 = vector.load %arg4[%c0_2, %c0_3] : memref<32x16xf32, #tpu.memory_space<vmem>>, vector<32x16xf32>
    %cst = arith.constant dense<0.000000e+00> : vector<8x16xf32>
    %9 = tpu.matmul %7, %8, %cst {dimension_numbers = #tpu.dot_dimension_numbers<[1], [0], [0], [1], [0, 0, 1, 1], [], []>} : vector<8x32xf32>, vector<32x16xf32>, vector<8x16xf32> -> vector<8x16xf32>
    %c0_4 = arith.constant 0 : index
    %c0_5 = arith.constant 0 : index
    %10 = vector.load %arg8[%c0_4, %c0_5] : memref<8x16xf32, #tpu.memory_space<vmem>>, vector<8x16xf32>
    %c0_6 = arith.constant 0 : index
    %c0_7 = arith.constant 0 : index
    %11 = vector.load %arg9[%c0_6, %c0_7] : memref<8x16xf32, #tpu.memory_space<vmem>>, vector<8x16xf32>
    %cst_8 = arith.constant dense<0.000000e+00> : vector<8x8xf32>
    %12 = tpu.matmul %9, %10, %cst_8 {dimension_numbers = #tpu.dot_dimension_numbers<[1], [1], [0], [0], [0, 0, 1, 0], [], []>} : vector<8x16xf32>, vector<8x16xf32>, vector<8x8xf32> -> vector<8x8xf32>
    %cst_9 = arith.constant 2.500000e-01 : f32
    %13 = vector.broadcast %cst_9 : f32 to vector<8x8xf32>
    %14 = arith.mulf %12, %13 : vector<8x8xf32>
    %15 = tpu.iota {dimensions = array<i32: 0>} : vector<8x8xi32>
    %16 = vector.broadcast %4 : i32 to vector<8x8xi32>
    %17 = arith.addi %16, %15 : vector<8x8xi32>
    %18 = tpu.iota {dimensions = array<i32: 1>} : vector<8x8xi32>
    %19 = arith.cmpi sle, %18, %17 : vector<8x8xi32>
    %cst_10 = arith.constant 0xFF800000 : f32
    %20 = vector.broadcast %cst_10 : f32 to vector<8x8xf32>
    %21 = arith.select %19, %14, %20 : vector<8x8xi1>, vector<8x8xf32>
    %cst_11 = arith.constant dense<0xFF800000> : vector<8xf32>
    %22 = vector.multi_reduction <maximumf>, %21, %cst_11 [1] : vector<8x8xf32> to vector<8xf32>
    %23 = vector.shape_cast %22 : vector<8xf32> to vector<8x1xf32>
    %24 = vector.broadcast %23 : vector<8x1xf32> to vector<8x8xf32>
    %25 = arith.subf %21, %24 : vector<8x8xf32>
    %26 = math.exp %25 : vector<8x8xf32>
    %cst_12 = arith.constant dense<0.000000e+00> : vector<8xf32>
    %27 = vector.multi_reduction <add>, %26, %cst_12 [1] : vector<8x8xf32> to vector<8xf32>
    %28 = vector.shape_cast %27 : vector<8xf32> to vector<8x1xf32>
    %29 = tpu.reciprocal %28 {approx = true} : vector<8x1xf32> -> vector<8x1xf32>
    %30 = vector.broadcast %29 : vector<8x1xf32> to vector<8x8xf32>
    %31 = arith.mulf %26, %30 : vector<8x8xf32>
    %cst_13 = arith.constant dense<0.000000e+00> : vector<8x16xf32>
    %32 = tpu.matmul %31, %11, %cst_13 {dimension_numbers = #tpu.dot_dimension_numbers<[1], [0], [0], [1], [0, 0, 1, 1], [], []>} : vector<8x8xf32>, vector<8x16xf32>, vector<8x16xf32> -> vector<8x16xf32>
    %c0_14 = arith.constant 0 : index
    %c0_15 = arith.constant 0 : index
    %c0_16 = arith.constant 0 : index
    %33 = vector.load %arg7[%c0_14, %c0_15, %c0_16] : memref<1x8x16xf32, #tpu.memory_space<vmem>>, vector<1x8x16xf32>
    %34 = vector.shape_cast %33 : vector<1x8x16xf32> to vector<8x16xf32>
    %35 = vector.shape_cast %32 : vector<8x16xf32> to vector<1x8x16xf32>
    tpu.vector_store %arg7[%c0_14, %c0_15, %c0_16], %35 {strides = array<i32>} : memref<1x8x16xf32, #tpu.memory_space<vmem>>, vector<1x8x16xf32>,
    return
  }
  func.func @transform_0(%arg0: i32, %arg1: i32, %arg2: memref<1xi32, #tpu.memory_space<smem>>) -> (i32, i32, i32) {
    %c0_i32 = arith.constant 0 : i32
    %c0_i32_0 = arith.constant 0 : i32
    %c0_i32_1 = arith.constant 0 : i32
    return %arg0, %c0_i32, %c0_i32_0 : i32, i32, i32
  }
  func.func @transform_1(%arg0: i32, %arg1: i32, %arg2: memref<1xi32, #tpu.memory_space<smem>>) -> (i32, i32) {
    %c0_i32 = arith.constant 0 : i32
    %c0_i32_0 = arith.constant 0 : i32
    %c0_i32_1 = arith.constant 0 : i32
    return %c0_i32, %c0_i32_0 : i32, i32
  }
  func.func @transform_2(%arg0: i32, %arg1: i32, %arg2: memref<1xi32, #tpu.memory_space<smem>>) -> (i32, i32) {
    %c0_i32 = arith.constant 0 : i32
    %c0_i32_0 = arith.constant 0 : i32
    %c0_i32_1 = arith.constant 0 : i32
    return %c0_i32, %c0_i32_0 : i32, i32
  }
  func.func @transform_3(%arg0: i32, %arg1: i32, %arg2: memref<1xi32, #tpu.memory_space<smem>>) -> (i32, i32) {
    %c0_i32 = arith.constant 0 : i32
    %c0_i32_0 = arith.constant 0 : i32
    %c0_i32_1 = arith.constant 0 : i32
    return %c0_i32, %c0_i32_0 : i32, i32
  }
  func.func @transform_4(%arg0: i32, %arg1: i32, %arg2: memref<1xi32, #tpu.memory_space<smem>>) -> (i32, i32, i32) {
    %c0_i32 = arith.constant 0 : i32
    %c0_i32_0 = arith.constant 0 : i32
    return %arg0, %arg1, %c0_i32 : i32, i32, i32
  }
}

</mosaic_0001>

<bundles_post_ra>
// kernel: tpu_custom_call.1
= control target key start
LH: loop header
LB: loop body
LE: loop exit
PB: predicated region body
PF: predicated region fallthrough
CT: control target
= control target key end

     0   :  { %11 = vsyncpa [#allocation7], 0  ;;  %s1123_s0 = inlined_call_operand.<no memory space> [shape: s32[1], index: 0, kind: input, shape index: {}]   ;;  %s1124_s1 = inlined_call_operand.vmem [shape: f32[2,8,32], index: 1, kind: input, shape index: {}]   ;;  %s1125_s2 = inlined_call_operand.vmem [shape: f32[32,16], index: 2, kind: input, shape index: {}]   ;;  %s1126_s3 = inlined_call_operand.vmem [shape: f32[32,16], index: 3, kind: input, shape index: {}]   ;;  %s1127_s4 = inlined_call_operand.vmem [shape: f32[32,16], index: 4, kind: input, shape index: {}]   ;;  %s1128_s5 = inlined_call_operand.hbm [shape: f32[2,8,16], index: 5, kind: output, shape index: {}]  }
   0x1   :  { %13 = vsyncpa [#allocation7 + $0x1], 0  ;;  %s960_s18 = smov 0   ;;  %s962_s0 = smov 0  }
   0x2   :  { %s964_s19 = smov 0   ;;  %s966_s20 = smov 0  }
   0x3   :  { %s968_s21 = smov 0   ;;  %s970_s22 = smov 0  }
   0x4 LB: > { %s709_s23 = sadd.s32 4294967295, %s925_s22   ;;  %s710_s24 = sadd.s32 4294967294, %s925_s22   ;;  %s925_s22 = sphi %s970_s22, %s19_s22   ;;  %s921_s21 = sphi %s968_s21, %s1135_s21   ;;  %s917_s20 = sphi %s966_s20, %s1134_s20   ;;  %s913_s19 = sphi %s964_s19, %s1133_s19   ;;  %s909_s0 = sphi %s962_s0, %s1132_s0   ;;  %s905_s18 = sphi %s960_s18, %s1131_s18  }
   0x5   : > { %s31_s25 = sadd.s32 1, %s921_s21  ;;  %s129_s26 = sadd.s32 1, %s913_s19 }
   0x6   : > { %p33_p0 = scmp.ge.s32.totalorder %s31_s25, 2  ;;  %p139_p1 = scmp.ne.s32.totalorder %s913_s19, %s909_s0 }
   0x7   : > { %p140_p2 = scmp.eq.s32.totalorder %s709_s23, 1  ;;  %p145_p3 = scmp.ne.s32.totalorder %s909_s0, %s905_s18 }
   0x8   : > { %s1137_s25 = smov (%p33_p0, %s31_s25), 0  ;;  %p146_p5 = scmp.eq.s32.totalorder %s710_s24, 1 }
   0x9   : > { %p1000_p4 = por %p140_p2, %p139_p1  ;;  %s124_s28 = ssub.s32 %s921_s21, %s1137_s25 }
   0xa   : > { %p713_p6 = scmp.ge.s32.totalorder %s925_s22, 1  ;;  %p127_p7 = scmp.eq.s32.totalorder %s124_s28, 0 }
   0xb   : > { %p1007_p8 = por %p146_p5, %p145_p3  ;;  %p180_p9 = scmp.lt.s32.totalorder %s925_s22, 3 }
   0xc   : > { %s1013_s30 = scalar_select %p127_p7, %s913_s19, %s129_s26  }
   0xd   : > { %p181_p10 = pnand %p713_p6, %p180_p9 }
   0xe   : > { %p205_p11 = scmp.lt.s32.totalorder (!%p181_p10), %s917_s20, 1  ;;  %s202_s24 = sand.u32 (!%p181_p10), 1, %s909_s0  }
   0xf   : > { %184 = sbr.rel (%p181_p10) target bundleno = 948 (0x3b4), region = 36  ;;  %s714_s26 = sshll.u32 (!%p181_p10), %s202_s24, 3 }
  0x10   : > { %s723_s28 = sshll.u32 (!%p181_p10), %s917_s20, 7  ;;  %s204_s6 = scalar_lea.vmem (!%p181_p10), [#allocation6], %s714_s26 }
  0x11   : > { %s639_s7 = sshll.u32 (!%p181_p10), %s204_s6, 4  ;;  %s625_s11 = scalar_lea.sflag (!%p181_p10), [#allocation7], %s202_s24  ;;  %s1078_s7 = int_to_ptr.vmem [resolvable:$true] %s639_s7 }
  0x12   : > { %s849_s12 = scalar_lea.vmem (!%p181_p10), %s1078_s7, 128 }
  0x13   : > { %p850_p12 = scmp.ne.s32.totalorder (!%p181_p10), %s1078_s7, %s849_s12 }
  0x14   : > { %v217_v0 = vld [vmem:[%s1126_s3 + $0x18] sm:$0xff]  ;;  %v927_v1 = vmov 0.0   ;;  %v216_v2 = vld [vmem:[%s1126_s3 + $0x10] sm:$0xff]  ;;  %vm928_vm0 = vmmov 0   ;;  %s206_s10 = scalar_select %p205_p11, %s917_s20, 1  ;;  %v215_v3 = vld [vmem:[%s1126_s3 + $0x8] sm:$0xff]  ;;  %v530_v22 = vlaneseq }
  0x15   : > { %745 = vmatprep.subr.mxu0 %v927_v1  ;;  %753 = vmatprep.mubr.msk.f32.mxu0 %vm928_vm0, %v927_v1  ;;  %v214_v4 = vld [vmem:[%s1126_s3] sm:$0xff]  ;;  %vm218_vm1 = vcmask 261120   ;;  %v375_v6 = vld [vmem:[%s1125_s2 + $0x18] sm:$0xff]  ;;  %v374_v7 = vld [vmem:[%s1125_s2 + $0x10] sm:$0xff]  ;;  %vm292_vm2 = vcmask 130048   ;;  %vm538_vm4 = vcmask 64512   ;;  %p851_p13 = pnand %p850_p12, %p1000_p4 }
  0x16   : > { %746 = vmatpush3.msra.mxu0 %v217_v0  ;;  %756 = vmatprep.subr.mxu1 %v927_v1  ;;  %s715_s13 = sshll.u32 %s206_s10, 3  ;;  %v373_v8 = vld [vmem:[%s1125_s2 + $0x8] sm:$0xff]  ;;  %v372_v9 = vld [vmem:[%s1125_s2] sm:$0xff]  ;;  %v297_v10 = vld [vmem:[%s1127_s4 + $0x18] sm:$0xff]  ;;  %v531_v23 = vshrl.u32 %v530_v22, 7  ;;  %v535_v24 = vand.u32 127, %v530_v22  ;;  %s1076_s10 = scalar_lea.hbm %s1128_s5, %s723_s28 }
  0x17   : > { %747 = vmatprep.subr.mxu0 %v927_v1  ;;  %764 = vmatprep.mubr.msk.f32.mxu1 %vm928_vm0, %v927_v1  ;;  %s208_s23 = scalar_lea.vmem %s1124_s1, %s715_s13  ;;  %v296_v11 = vld [vmem:[%s1127_s4 + $0x10] sm:$0xff]  ;;  %v295_v12 = vld [vmem:[%s1127_s4 + $0x8] sm:$0xff]  ;;  %v294_v13 = vld [vmem:[%s1127_s4] sm:$0xff]  ;;  %p852_p0 = pneg %p851_p13 }
  0x18   : > { %748 = vmatpush3.msra.mxu0 %v216_v2  ;;  %v213_v5 = vld [vmem:[%s208_s23] sm:$0xff]  ;;  %757 = vmatpush3.msra.mxu1 %v297_v10  ;;  %vm536_vm3 = vcmp.le.s32.totalorder %v535_v24, %v531_v23  ;;  %s929_s20 = smov [#allocation6]  }
  0x19   : > { %749 = vmatprep.subr.mxu0 %v927_v1  ;;  %758 = vmatprep.subr.mxu1 %v927_v1  ;;  %s853_s13 = sshll.u32 %s929_s20, 4  ;;  %s854_s13 = int_to_ptr.vmem [resolvable:$false] %s853_s13 }
  0x1a   : > { %750 = vmatpush3.msra.mxu0 %v215_v3  ;;  %759 = vmatpush3.msra.mxu1 %v296_v11  ;;  %s855_s14 = scalar_lea.vmem %s854_s13, 256  ;;  %p856_p1 = scmp.lt.s32.totalorder %s1078_s7, %s854_s13 }
  0x1b   : > { %751 = vmatprep.subr.mxu0 %v927_v1  ;;  %760 = vmatprep.subr.mxu1 %v927_v1  ;;  %p857_p2 = scmp.lt.s32.totalorder %s855_s14, %s849_s12 }
  0x1c   : > { %752 = vmatpush3.msra.mxu0 %v214_v4  ;;  %761 = vmatpush3.msra.mxu1 %v295_v12 }
  0x1d   : > { %754 = vmatmul.mubr.msk.f32.vlgmr.msra.gmra.mxu0 %vm218_vm1, %v213_v5  ;;  %767 = vmatprep.subr.mxu0 %v927_v1  ;;  %p858_p3 = por %p857_p2, %p856_p1 }
  0x1e   : > { %768 = vmatpush3.msra.mxu0 %v375_v6  ;;  %775 = vmatprep.mubr.msk.f32.mxu0 %vm928_vm0, %v927_v1 }
  0x1f   : > { %769 = vmatprep.subr.mxu0 %v927_v1  ;;  %762 = vmatprep.subr.mxu1 %v927_v1  ;;  %p859_p5 = pnand %p858_p3, %p852_p0 }
  0x20   : > { %770 = vmatpush3.msra.mxu0 %v374_v7  ;;  %763 = vmatpush3.msra.mxu1 %v294_v13 }
  0x21   : > { %771 = vmatprep.subr.mxu0 %v927_v1  ;;  %765 = vmatmul.mubr.msk.f32.vlgmr.msra.gmra.mxu1 %vm218_vm1, %v213_v5 }
  0x22   : > { %772 = vmatpush3.msra.mxu0 %v373_v8  ;;  %778 = vmatprep.subr.mxu1 %v927_v1 }
  0x23   : > { %773 = vmatprep.subr.mxu0 %v927_v1  ;;  %780 = vmatprep.mubr.msk.f32.mxu1 %vm928_vm0, %v927_v1 }
  0x24   : > { %774 = vmatpush3.msra.mxu0 %v372_v9 }
  0x25   : > { %776 = vmatmul.mubr.msk.f32.vlgmr.msra.gmra.mxu0 %vm218_vm1, %v213_v5 }
  0xdd   : > { %v288_v14 = vpop.f32.mrf.mxu0 }
  0xde   : > { %293 = vst.msk [vmem:[#allocation2] sm:$0xff] %vm292_vm2, %v288_v14 }
  0xdf   : > { %v755_v15 = vpop.f32.mrf.mxu0 }
  0xe1   : > { %v364_v19 = vpop.f32.mrf.mxu1 }
  0xe2   : > { %368 = vst.msk [vmem:[#allocation3] sm:$0xff] %vm292_vm2, %v364_v19 }
  0xe3   : > { %v766_v20 = vpop.f32.mrf.mxu1 }
  0xe5   : > { %v450_v16 = vld [vmem:[#allocation2] sm:$0xff]  ;;  %v446_v17 = vpop.f32.mrf.mxu0 }
  0xe6   : > { %779 = vmatpush3.xpose.msk.msra.mxu1 %vm292_vm2, %v450_v16 }
  0xe7   : > { %v777_v18 = vpop.f32.mrf.mxu0  ;;  %783 = vmatprep.subr.mxu1 %v927_v1 }
  0xe9   : > { %781 = vmatmul.mubr.msk.f32.vlgmr.msra.gmra.mxu1 %vm292_vm2, %v446_v17  ;;  %v451_v21 = vld [vmem:[#allocation3] sm:$0xff] }
  0xea   : > { %785 = vmatprep.mubr.msk.f32.mxu1 %vm928_vm0, %v927_v1  ;;  %784 = vmatpush3.msra.mxu1 %v451_v21 }
 0x1a9   : > { %v525_v25 = vpop.f32.mrf.mxu1 }
 0x1aa   : > { %v529_v26 = vmul.f32 0.25, %v525_v25 }
 0x1ab   : > { %v782_v27 = vpop.f32.mrf.mxu1 }
 0x1ac   : > { %v537_v28 = vsel %vm536_vm3, %v529_v26, -inf }
 0x1ad   : > { %v539_v29 = vsel %vm538_vm4, %v537_v28, -inf }
 0x1ae   : > { %540 = vmax.xlane.f32.xlu0 %v539_v29 }
 0x237   : > { %v541_v30 = vpop.xlane.xlu0 %540 }
 0x238   : > { %v542_v31 = vsub.f32 %v537_v28, %v541_v30 }
 0x23a   : > { %v543_v32 = vmul.f32 1.442695, %v542_v31 }
 0x23c   : > { %845 = vpow2.f32 %v543_v32 }
 0x249   : > { %v846_v33 = vpop.eup %845 }
 0x24a   : > { %v545_v34 = vsel %vm538_vm4, %v846_v33, 0.0 }
 0x24b   : > { %546 = vadd.xlane.f32.xlu0 %v545_v34 }
 0x2d4   : > { %v547_v35 = vpop.xlane.xlu0 %546 }
 0x2d5   : > { %847 = vrcp.f32 %v547_v35 }
 0x2e2   : > { %v848_v36 = vpop.eup %847 }
 0x2e3   : > { %v549_v37 = vmul.f32 %v848_v36, %v846_v33 }
 0x2e5   : > { %786 = vmatmul.mubr.msk.f32.vlgmr.msra.gmra.mxu1 %vm538_vm4, %v549_v37 }
 0x3a5   : > { %v619_v38 = vpop.f32.mrf.mxu1 }
 0x3a6   : > { %623 = vst.msk [vmem:[%s204_s6] sm:$0xff] %vm292_vm2, %v619_v38 }
 0x3a7   : > { %v787_v39 = vpop.f32.mrf.mxu1 }
 0x3a8   : > { %862 = shalt.err (!%p859_p5)
}
 0x3a9   : > { %s863_s15 = scalar_lea.hbm %s1076_s10, 128  ;;  %s867_s23 = scalar_lea.hbm %s1128_s5, 256 }
 0x3aa   : > { %p864_p6 = scmp.ne.s32.totalorder %s1076_s10, %s863_s15  ;;  %p868_p10 = scmp.lt.s32.totalorder %s1076_s10, %s1128_s5 }
 0x3ab   : > { %p869_p11 = scmp.lt.s32.totalorder %s867_s23, %s863_s15 }
 0x3ac   : > { %p865_p7 = pnand %p864_p6, %p1000_p4 }
 0x3ad   : > { %p870_p12 = por %p869_p11, %p868_p10 }
 0x3ae   : > { %p866_p9 = pneg %p865_p7 }
 0x3b0   : > { %p871_p13 = pnand %p870_p12, %p866_p9 }
 0x3b2   : > { %874 = shalt.err (!%p871_p13)
}
 0x3b3   : > { %788 = dma.vmem_to_hbm [thread:$0]  (%p1000_p4), %s1078_s7, 128, %s1076_s10, %s625_s11  }
 0x3b4 PF: > { %p794_p0 = scmp.ge.s32.totalorder %s925_s22, 2  ;;  %s651_s28 = sand.u32 1, %s905_s18  }
 0x3b5   : > { %s652_s6 = scalar_lea.sflag [#allocation7], %s651_s28 }
 0x3b6   : > { %p791_p1 = pnand %p794_p0, %p1007_p8 }
 0x3b8   : > { %p792_p2 = pneg %p791_p1 }
 0x3ba   : > { %900 = dma.done.wait (%p792_p2), %s652_s6, 128  }
 0x3bb   : > { %902 = vsyncadd (%p792_p2), %s652_s6, 4294967168  ;;  %s19_s22 = sadd.s32 1, %s925_s22   ;;  %s1131_s18 = smov %s909_s0 }
 0x3bc   : > { %p16_p3 = scmp.ge.s32.totalorder %s19_s22, 4   ;;  %s1132_s0 = smov %s913_s19 }
 0x3bd   : > { %s1133_s19 = smov %s1013_s30  ;;  %s1134_s20 = smov %s921_s21 }
 0x3be   : > { %s1135_s21 = smov %s1137_s25  ;;  %18 = sbr.rel (!%p16_p3) target bundleno = 4 (0x4), region = 76 }
 0x3c3   :  { %657 = vsyncpa [#allocation7], 1 }
 0x3c4   :  { %659 = vsyncpa [#allocation7 + $0x1], 1 }

</bundles_post_ra>
